<compile_context>
chip_gen: v7x
topology: tpu7x:2x2x1
jax: 0.10.0
libtpu: 0.0.40
codegen_flags: <defaults>
</compile_context>

<pallas_src>
import jax
import jax.numpy as jnp
from jax.experimental import pallas as pl
from jax.experimental.pallas import tpu as pltpu

GAMMA = 1e-10              # matches BPRLoss(gamma=1e-10)
LANES = 128                # TPU lane width
SUBLANES = 8               # f32 sublanes per vreg
MAX_TILE_ROWS = 8192       # 8192 * 128 * 4 B = 4 MiB per input per buffer (f32)
CHUNK_ROWS = 256           # rows folded per fori_loop iteration (32 vregs/input)
_PAD_DIFF = 1e4            # tanh(5e3)==1 -> sig==1 -> log(1+gamma)==0.0f exactly
_VMEM_LIMIT = 48 * 1024 * 1024  # explicit scoped-VMEM limit (fits v5e..v7x)


def _round_up(x, m):
    return ((x + m - 1) // m) * m


def _make_kernel(tile_rows, chunk_rows, valid_rows, need_mask):
    """Build the per-block kernel.  One grid step folds a (tile_rows, 128)
    tile into an (8, 128) partial sum of log(gamma + sigmoid(pos - neg))."""
    n_chunks = tile_rows // chunk_rows

    def kernel(pos_ref, neg_ref, out_ref):
        if need_mask:
            block_row0 = pl.program_id(0) * tile_rows
            base_iota = jax.lax.broadcasted_iota(
                jnp.int32, (chunk_rows, LANES), 0)

        def body(c, acc):
            r0 = pl.multiple_of(c * chunk_rows, chunk_rows)
            p = pos_ref[pl.ds(r0, chunk_rows), :].astype(jnp.float32)
            q = neg_ref[pl.ds(r0, chunk_rows), :].astype(jnp.float32)
            d = p - q
            if need_mask:
                # Rows past the logical end get d = +1e4 -> contribution 0.
                row = base_iota + (block_row0 + c * chunk_rows)
                d = jnp.where(row < valid_rows, d, _PAD_DIFF)
            # Exact sigmoid via tanh identity: 2 EUP ops (tanh, log), no divide.
            sig = 0.5 * (jnp.tanh(0.5 * d) + 1.0)
            vals = jnp.log(GAMMA + sig)
            # Fold rows into one vreg-shaped partial: pure VPU adds, no XLU.
            return acc + vals.reshape(-1, SUBLANES, LANES).sum(axis=0)

        acc0 = jnp.zeros((SUBLANES, LANES), jnp.float32)
        acc = jax.lax.fori_loop(0, n_chunks, body, acc0,
                                unroll=min(n_chunks, 8))
        out_ref[...] = acc

    return kernel


def _elem_log_sigmoid_gamma(pos, neg):
    """Plain-JAX per-element log(gamma + sigmoid(pos - neg)) for tiny tails."""
    d = pos.astype(jnp.float32) - neg.astype(jnp.float32)
    return jnp.log(GAMMA + jax.nn.sigmoid(d))


@jax.jit
def bpr_loss(pos_score, neg_score):
    """BPR loss via Pallas.  pos_score / neg_score: same-shape float arrays."""
    assert pos_score.shape == neg_score.shape
    cdt = jnp.result_type(pos_score.dtype, neg_score.dtype)
    if (not jnp.issubdtype(cdt, jnp.floating)) or jnp.dtype(cdt).itemsize > 4:
        cdt = jnp.float32
    pos = pos_score.reshape(-1).astype(cdt)   # no-op for native f32/bf16/f16
    neg = neg_score.reshape(-1).astype(cdt)
    n = pos.shape[0]

    itemsize = jnp.dtype(cdt).itemsize
    sub_mult = max(SUBLANES, SUBLANES * (4 // itemsize))  # 8 f32, 16 bf16/f16

    rem = n % LANES
    n_main = n - rem

    total = jnp.zeros((), jnp.float32)
    if rem:
        # <128-element tail handled in plain JAX (no 2N-float padding copy).
        total = total + jnp.sum(
            _elem_log_sigmoid_gamma(pos[n_main:], neg[n_main:]))

    if n_main:
        rows = n_main // LANES
        # When rem == 0 this reshape is a zero-copy bitcast of the inputs; when
        # rem != 0 the prefix slice may materialize a copy (still cheaper than
        # the old pad+concat, which also wrote the padding).
        pos2d = pos[:n_main].reshape(rows, LANES)
        neg2d = neg[:n_main].reshape(rows, LANES)

        if rows <= CHUNK_ROWS:
            # Small-N fast path: single block, single chunk.
            tile_rows = _round_up(rows, sub_mult)
            chunk_rows = tile_rows
        else:
            tile_rows = min(MAX_TILE_ROWS, _round_up(rows, CHUNK_ROWS))
            chunk_rows = CHUNK_ROWS
        num_blocks = pl.cdiv(rows, tile_rows)
        need_mask = (num_blocks * tile_rows != rows)

        kernel = _make_kernel(tile_rows, chunk_rows, rows, need_mask)
        partials = pl.pallas_call(
            kernel,
            out_shape=jax.ShapeDtypeStruct(
                (num_blocks * SUBLANES, LANES), jnp.float32),
            grid=(num_blocks,),
            in_specs=[
                pl.BlockSpec((tile_rows, LANES), lambda i: (i, 0)),
                pl.BlockSpec((tile_rows, LANES), lambda i: (i, 0)),
            ],
            out_specs=pl.BlockSpec((SUBLANES, LANES), lambda i: (i, 0)),
            compiler_params=pltpu.CompilerParams(
                # Independent blocks -> megacore-shardable on v7x's 2 TCs.
                dimension_semantics=("parallel",),
                vmem_limit_bytes=_VMEM_LIMIT,
            ),
        )(pos2d, neg2d)
        # Tiny final reduction over the per-block (8, 128) partials.
        total = total + jnp.sum(partials)

    return -total


def bpr_loss_ref(pos_score, neg_score):
    """Pure-JAX reference matching the PyTorch module semantics."""
    return -jnp.sum(jnp.log(GAMMA + jax.nn.sigmoid(pos_score - neg_score)))


if __name__ == "__main__":
    key = jax.random.PRNGKey(0)
    k1, k2, k3, k4 = jax.random.split(key, 4)

    # Small lane-aligned case (single block, no masking, no tail).
    N = 2048
    pos_score = jax.random.normal(k1, (N,), dtype=jnp.float32)
    neg_score = jax.random.normal(k2, (N,), dtype=jnp.float32)
    loss = jax.block_until_ready(bpr_loss(pos_score, neg_score))
    ref = bpr_loss_ref(pos_score, neg_score)
    assert jnp.allclose(loss, ref, rtol=1e-4, atol=1e-3), (loss, ref)

    # Small misaligned case (exercises in-kernel row mask + plain-JAX tail).
    M = 1000
    pos2 = jax.random.normal(k3, (M,), dtype=jnp.float32)
    neg2 = jax.random.normal(k4, (M,), dtype=jnp.float32)
    loss2 = jax.block_until_ready(bpr_loss(pos2, neg2))
    ref2 = bpr_loss_ref(pos2, neg2)
    assert jnp.allclose(loss2, ref2, rtol=1e-4, atol=1e-3), (loss2, ref2)

    print("KERNEL_OK")
</pallas_src>

<mosaic_0001>
module attributes {stable_mosaic.version = 11 : i64} {
  func.func @kernel(%arg0: i32, %arg1: memref<16x128xf32, #tpu.memory_space<vmem>>, %arg2: memref<16x128xf32, #tpu.memory_space<vmem>>, %arg3: memref<8x128xf32, #tpu.memory_space<vmem>>) attributes {dimension_semantics = [#tpu.dimension_semantics<parallel>], iteration_bounds = array<i64: 1>, scalar_prefetch = 0 : i64, scratch_operands = 0 : i64, tpu.core_type = #tpu.core_type<tc>, window_params = [{transform_indices = @transform_0, window_bounds = array<i64: 16, 128>}, {transform_indices = @transform_1, window_bounds = array<i64: 16, 128>}, {transform_indices = @transform_2, window_bounds = array<i64: 8, 128>}]} {
    %cst = arith.constant 0.000000e+00 : f32
    %0 = vector.broadcast %cst : f32 to vector<8x128xf32>
    %c0_i32 = arith.constant 0 : i32
    %c16_i32 = arith.constant 16 : i32
    %1 = arith.muli %c0_i32, %c16_i32 : i32
    %2 = tpu.assume_multiple %1, 16 : i32
    %3 = arith.index_cast %2 : i32 to index
    %c0 = arith.constant 0 : index
    %4 = vector.load %arg1[%3, %c0] : memref<16x128xf32, #tpu.memory_space<vmem>>, vector<16x128xf32>
    %5 = arith.index_cast %2 : i32 to index
    %c0_0 = arith.constant 0 : index
    %6 = vector.load %arg2[%5, %c0_0] : memref<16x128xf32, #tpu.memory_space<vmem>>, vector<16x128xf32>
    %7 = arith.subf %4, %6 : vector<16x128xf32>
    %cst_1 = arith.constant 5.000000e-01 : f32
    %8 = vector.broadcast %cst_1 : f32 to vector<16x128xf32>
    %9 = arith.mulf %8, %7 : vector<16x128xf32>
    %10 = math.tanh %9 : vector<16x128xf32>
    %cst_2 = arith.constant 1.000000e+00 : f32
    %11 = vector.broadcast %cst_2 : f32 to vector<16x128xf32>
    %12 = arith.addf %10, %11 : vector<16x128xf32>
    %cst_3 = arith.constant 5.000000e-01 : f32
    %13 = vector.broadcast %cst_3 : f32 to vector<16x128xf32>
    %14 = arith.mulf %13, %12 : vector<16x128xf32>
    %cst_4 = arith.constant 1.000000e-10 : f32
    %15 = vector.broadcast %cst_4 : f32 to vector<16x128xf32>
    %16 = arith.addf %15, %14 : vector<16x128xf32>
    %17 = math.log %16 : vector<16x128xf32>
    %18 = vector.shape_cast %17 : vector<16x128xf32> to vector<2x8x128xf32>
    %cst_5 = arith.constant dense<0.000000e+00> : vector<8x128xf32>
    %19 = vector.multi_reduction <add>, %18, %cst_5 [0] : vector<2x8x128xf32> to vector<8x128xf32>
    %20 = arith.addf %0, %19 : vector<8x128xf32>
    %c1_i32 = arith.constant 1 : i32
    %c0_6 = arith.constant 0 : index
    %c0_7 = arith.constant 0 : index
    %21 = vector.load %arg3[%c0_6, %c0_7] : memref<8x128xf32, #tpu.memory_space<vmem>>, vector<8x128xf32>
    tpu.vector_store %arg3[%c0_6, %c0_7], %20 {strides = array<i32>} : memref<8x128xf32, #tpu.memory_space<vmem>>, vector<8x128xf32>,
    return
  }
  func.func @transform_0(%arg0: i32) -> (i32, i32) {
    %c0_i32 = arith.constant 0 : i32
    %c0_i32_0 = arith.constant 0 : i32
    return %arg0, %c0_i32 : i32, i32
  }
  func.func @transform_1(%arg0: i32) -> (i32, i32) {
    %c0_i32 = arith.constant 0 : i32
    %c0_i32_0 = arith.constant 0 : i32
    return %arg0, %c0_i32 : i32, i32
  }
  func.func @transform_2(%arg0: i32) -> (i32, i32) {
    %c0_i32 = arith.constant 0 : i32
    %c0_i32_0 = arith.constant 0 : i32
    return %arg0, %c0_i32 : i32, i32
  }
}

</mosaic_0001>

<bundles_post_ra>
// kernel: bpr_loss.1
= control target key start
LH: loop header
LB: loop body
LE: loop exit
PB: predicated region body
PF: predicated region fallthrough
CT: control target
= control target key end

     0   :  { %7 = vsyncpa [#allocation3], 0  ;;  %s174_s0 = inlined_call_operand.hbm [shape: f32[16,128], index: 0, kind: input, shape index: {}]   ;;  %s175_s1 = inlined_call_operand.hbm [shape: f32[16,128], index: 1, kind: input, shape index: {}]   ;;  %s176_s2 = inlined_call_operand.vmem [shape: f32[8,128], index: 2, kind: output, shape index: {}]  }
   0x1   :  { %8 = vsyncpa [#allocation5], 0  ;;  %s128_s9 = smov [#allocation2]   ;;  %s80_s13 = scalar_lea.hbm %s174_s0, 256 }
   0x2   :  { %s14_s10 = sshll.u32 %s128_s9, 4  ;;  %p81_p0 = scmp.ne.s32.totalorder %s174_s0, %s80_s13  ;;  %s15_s10 = int_to_ptr.vmem [resolvable:$true] %s14_s10 }
   0x3   :  { %p84_p1 = scmp.lt.u32.totalorder %s80_s13, %s174_s0 }
   0x5   :  { %p86_p2 = pnand %p84_p1, %p81_p0 }
   0x7   :  { %89 = shalt.err (!%p86_p2)
}
   0x8   :  { %s90_s18 = scalar_lea.vmem %s15_s10, 256  ;;  %p95_p4 = scmp.lt.s32.totalorder %s15_s10, %s15_s10 }
   0x9   :  { %p91_p3 = scmp.ne.s32.totalorder %s15_s10, %s90_s18  ;;  %p96_p5 = scmp.lt.s32.totalorder %s90_s18, %s90_s18 }
   0xb   :  { %p97_p6 = por %p96_p5, %p95_p4 }
   0xd   :  { %p98_p7 = pnand %p97_p6, %p91_p3 }
   0xf   :  { %101 = shalt.err (!%p98_p7)
}
  0x10   :  { %s129_s19 = smov 128   ;;  %s130_s20 = smov 8  }
  0x11   :  { %20 = dma.hbm_to_vmem [thread:$0]  %s174_s0, 256, %s15_s10, [#allocation3], %s129_s19, %s129_s19, %s130_s20  }
  0x12   :  { %s131_s23 = smov [#allocation4]   ;;  %s102_s27 = scalar_lea.hbm %s175_s1, 256 }
  0x13   :  { %s26_s24 = sshll.u32 %s131_s23, 4  ;;  %p103_p8 = scmp.ne.s32.totalorder %s175_s1, %s102_s27  ;;  %s27_s24 = int_to_ptr.vmem [resolvable:$true] %s26_s24 }
  0x14   :  { %p106_p9 = scmp.lt.u32.totalorder %s102_s27, %s175_s1 }
  0x16   :  { %p108_p10 = pnand %p106_p9, %p103_p8 }
  0x18   :  { %111 = shalt.err (!%p108_p10)
}
  0x19   :  { %s112_s4 = scalar_lea.vmem %s27_s24, 256  ;;  %p117_p12 = scmp.lt.s32.totalorder %s27_s24, %s27_s24 }
  0x1a   :  { %p113_p11 = scmp.ne.s32.totalorder %s27_s24, %s112_s4  ;;  %p118_p13 = scmp.lt.s32.totalorder %s112_s4, %s112_s4 }
  0x1c   :  { %p119_p0 = por %p118_p13, %p117_p12 }
  0x1e   :  { %p120_p1 = pnand %p119_p0, %p113_p11 }
  0x20   :  { %123 = shalt.err (!%p120_p1)
}
  0x21   :  { %32 = dma.hbm_to_vmem [thread:$0]  %s175_s1, 256, %s27_s24, [#allocation5], %s129_s19, %s129_s19, %s130_s20  }
  0x22   :  { %124 = dma.done.wait [#allocation3], 256  }
  0x23   :  { %125 = vsyncadd [#allocation3], 4294967040 }
  0x24   :  { %126 = dma.done.wait [#allocation5], 256  }
  0x25   :  { %127 = vsyncadd [#allocation5], 4294967040  ;;  %v39_v0 = vld [vmem:[#allocation2] sm:$0xff]  ;;  %v40_v1 = vld [vmem:[#allocation2 + $0x8] sm:$0xff] }
  0x26   :  { %v41_v2 = vld [vmem:[#allocation4] sm:$0xff]  ;;  %v42_v3 = vld [vmem:[#allocation4 + $0x8] sm:$0xff] }
  0x27   :  { %v43_v4 = vsub.f32 %v39_v0, %v41_v2  ;;  %v44_v5 = vsub.f32 %v40_v1, %v42_v3 }
  0x29   :  { %v45_v6 = vmul.f32 0.5, %v43_v4  ;;  %v46_v7 = vmul.f32 0.5, %v44_v5 }
  0x2b   :  { %72 = vtanh.f32 %v45_v6 }
  0x2c   :  { %74 = vtanh.f32 %v46_v7 }
  0x35   :  { %v73_v8 = vpop.eup %72 }
  0x36   :  { %v75_v9 = vpop.eup %74  ;;  %v49_v10 = vadd.f32 1.0, %v73_v8 }
  0x37   :  { %v50_v11 = vadd.f32 1.0, %v75_v9 }
  0x38   :  { %v51_v12 = vmul.f32 0.5, %v49_v10 }
  0x39   :  { %v52_v13 = vmul.f32 0.5, %v50_v11 }
  0x3a   :  { %v53_v14 = vadd.f32 1e-10, %v51_v12 }
  0x3b   :  { %v54_v15 = vadd.f32 1e-10, %v52_v13 }
  0x3c   :  { %76 = vlog2.f32 %v53_v14 }
  0x3d   :  { %78 = vlog2.f32 %v54_v15 }
  0x46   :  { %v77_v16 = vpop.eup %76 }
  0x47   :  { %v79_v17 = vpop.eup %78  ;;  %v56_v18 = vmul.f32 0.6931472, %v77_v16 }
  0x48   :  { %v58_v19 = vmul.f32 0.6931472, %v79_v17 }
  0x4a   :  { %v59_v20 = vadd.f32 %v58_v19, %v56_v18 }
  0x4c   :  { %61 = vst [vmem:[%s176_s2] sm:$0xff] %v59_v20 }
  0x4d   :  { %66 = vsyncpa [#allocation3], 1 }
  0x4e   :  { %67 = vsyncpa [#allocation5], 1 }

</bundles_post_ra>
